<compile_context>
chip_gen: v5e
topology: v5e:2x2
jax: 0.10.0
libtpu: 0.0.40
codegen_flags: <defaults>
</compile_context>

<pallas_src>
import functools

import jax
import jax.numpy as jnp
from jax.experimental import pallas as pl
from jax.experimental.pallas import tpu as pltpu

# Module hyper-parameters (from PrimaryCapsule.__init__ defaults)
NUM_CAPS = 8
IN_C = 64
OUT_C = 8
K = 3
NC = NUM_CAPS * OUT_C          # fused capsule*channel width = 64
BN_EPS = 1e-5
SQUASH_EPS = 1e-8


def _primary_capsule_kernel(x_ref, w_ref, b_ref, g_ref, o_ref, *, valid_rows):
    """One batch-tile grid step: fused conv1d (+folded BN/bias) + squash.

    x_ref: (M, IN_C)      flattened (batch_tile*L, 64) activations     (VMEM)
    w_ref: (K, IN_C, NC)  BN-folded weights, NC = caps*out_C = 64      (VMEM)
    b_ref: (1, NC)        BN-folded bias                               (VMEM)
    g_ref: (NC, NC)       block-diagonal ones (capsule group matrix)   (VMEM)
    o_ref: (M, NC)        output slab; only the first `valid_rows` rows are
                          written (the tail rows are the partial conv windows
                          and are dropped by the wrapper).
    """
    x = x_ref[...]  # (M, IN_C) f32

    # Conv1d (valid, stride 1): K shifted accumulations of (M,64)@(64,64) MXU
    # matmuls.  The shift is applied to the *result* rows (static slices on
    # the narrow result), never to the wide input block.
    acc = jnp.dot(x, w_ref[0], preferred_element_type=jnp.float32)[:valid_rows, :]
    for k in range(1, K):  # K is static and tiny -> unrolled
        y = jnp.dot(x, w_ref[k], preferred_element_type=jnp.float32)
        acc = acc + y[k:k + valid_rows, :]

    # Folded conv-bias + inference BatchNorm affine.
    u = acc + b_ref[...]                              # (valid_rows, NC)

    # squash over each capsule's 8 channels.  Column j = c*OUT_C + o; the
    # block-diagonal ones matmul returns, per column, the squared norm of the
    # owning capsule, already broadcast across its 8 columns.
    sq = jnp.dot(u * u, g_ref[...], preferred_element_type=jnp.float32)
    out = (u * sq) / ((1.0 + sq) * (jnp.sqrt(sq) + SQUASH_EPS))

    o_ref[:valid_rows, :] = out.astype(o_ref.dtype)


def _pick_batch_tile(b, l):
    """Examples per grid step.

    Prefer >= 2 grid steps (v7x has 2 TensorCores to shard the 'parallel' axis
    across) while batching as much as possible per step to amortize per-step
    pipeline overhead, keeping the second-minor block dim a multiple of 8.
    """
    cap = min(8, max(1, b // 2))
    for tb in range(cap, 0, -1):
        if b % tb == 0 and (tb * l) % 8 == 0:
            return tb
    return b  # single step over the full flattened batch (block == full array)


def primary_capsule_forward(x_ncl, weights, bias, bn_params, *, batch_tile=None):
    """x_ncl: (B, C_in, L) float32 (PyTorch NCL layout).

    weights:   (NUM_CAPS, OUT_C, IN_C, K)   -- PyTorch Conv1d weight layout
    bias:      (NUM_CAPS, OUT_C)
    bn_params: (4, OUT_C)  rows = gamma, beta, running_mean, running_var
    returns:   (B, NUM_CAPS * L_out, OUT_C)
    """
    b, c_in, l = x_ncl.shape
    assert c_in == IN_C
    l_out = l - K + 1

    # ---- host-side constant folding & layout plumbing (no activation math) ----
    gamma, beta, mean, var = bn_params
    s = gamma / jnp.sqrt(var + BN_EPS)                                   # (OUT_C,)
    # (caps, out_C, in_C, K) -> (K, in_C, caps, out_C), scale per out channel,
    # flatten caps*channel so fused column j = c*OUT_C + o.
    w_f = (jnp.transpose(weights, (3, 2, 0, 1)) * s[None, None, None, :]
           ).reshape(K, IN_C, NC)
    b_f = ((bias - mean[None, :]) * s[None, :] + beta[None, :]).reshape(1, NC)
    # Block-diagonal ones: capsule-group reduction matrix for squash.
    grp = jnp.arange(NC) // OUT_C
    g = (grp[:, None] == grp[None, :]).astype(jnp.float32)               # (NC, NC)
    # NCL -> lane-dense (B*L, C_in) activation slab.
    x_flat = jnp.transpose(x_ncl, (0, 2, 1)).reshape(b * l, IN_C)

    tb = batch_tile if batch_tile is not None else _pick_batch_tile(b, l)
    assert b % tb == 0
    m_rows = tb * l                  # rows per grid step
    valid_rows = m_rows - (K - 1)    # rows with a fully valid conv window

    kernel = functools.partial(_primary_capsule_kernel, valid_rows=valid_rows)

    out_flat = pl.pallas_call(
        kernel,
        out_shape=jax.ShapeDtypeStruct((b * l, NC), jnp.float32),
        grid_spec=pltpu.PrefetchScalarGridSpec(
            num_scalar_prefetch=0,
            grid=(b // tb,),
            in_specs=[
                pl.BlockSpec((m_rows, IN_C), lambda i: (i, 0)),
                pl.BlockSpec((K, IN_C, NC), lambda i: (0, 0, 0)),
                pl.BlockSpec((1, NC), lambda i: (0, 0)),
                pl.BlockSpec((NC, NC), lambda i: (0, 0)),
            ],
            out_specs=pl.BlockSpec((m_rows, NC), lambda i: (i, 0)),
        ),
        compiler_params=pltpu.CompilerParams(
            dimension_semantics=("parallel",),
        ),
    )(x_flat, w_f, b_f, g)

    # Row t*L+i, col c*OUT_C+o  ->  (B, caps*L_out, OUT_C) with row c*L_out+i,
    # matching torch.cat(dim=2) + permute(0, 2, 1).  Rows i >= L_out per example
    # (partial / unwritten conv windows) are dropped here.
    out = out_flat.reshape(b, l, NUM_CAPS, OUT_C)[:, :l_out]
    return jnp.transpose(out, (0, 2, 1, 3)).reshape(b, NUM_CAPS * l_out, OUT_C)


def _reference_forward(x_ncl, weights, bias, bn_params):
    """Pure-jnp reference mirroring the PyTorch forward (BN in eval mode)."""
    b, _, l = x_ncl.shape
    l_out = l - K + 1
    patches = jnp.stack(
        [x_ncl[:, :, k:k + l_out] for k in range(K)], axis=-1
    )  # (B, C_in, L_out, K)
    conv = jnp.einsum("bilk,coik->bcol", patches, weights,
                      precision=jax.lax.Precision.HIGHEST)  # (B, caps, out_C, L_out)
    conv = conv + bias[None, :, :, None]
    # torch.cat along dim=2 of the NCL conv outputs:
    cat = jnp.transpose(conv, (0, 2, 1, 3)).reshape(b, OUT_C, NUM_CAPS * l_out)
    gamma, beta, mean, var = bn_params
    bn = (cat - mean[None, :, None]) / jnp.sqrt(var[None, :, None] + BN_EPS)
    bn = bn * gamma[None, :, None] + beta[None, :, None]
    u = jnp.transpose(bn, (0, 2, 1))  # (B, caps*L_out, out_C)
    sq = jnp.sum(u * u, axis=-1, keepdims=True)
    return (sq / (1.0 + sq)) * u / (jnp.sqrt(sq) + SQUASH_EPS)


if __name__ == "__main__":
    key = jax.random.PRNGKey(0)
    kx, kw, kb, kg, kbe, km, kv = jax.random.split(key, 7)

    B, L = 2, 16  # small shapes: x is (B, IN_C, L) = (2, 64, 16)
    x = jax.random.normal(kx, (B, IN_C, L), dtype=jnp.float32)

    # Deterministic synthetic parameters (shapes from the module __init__).
    weights = 0.1 * jax.random.normal(kw, (NUM_CAPS, OUT_C, IN_C, K), jnp.float32)
    bias = 0.1 * jax.random.normal(kb, (NUM_CAPS, OUT_C), jnp.float32)
    gamma = 1.0 + 0.1 * jax.random.normal(kg, (OUT_C,), jnp.float32)
    beta = 0.1 * jax.random.normal(kbe, (OUT_C,), jnp.float32)
    run_mean = 0.1 * jax.random.normal(km, (OUT_C,), jnp.float32)
    run_var = jax.random.uniform(kv, (OUT_C,), jnp.float32, 0.5, 1.5)
    bn_params = jnp.stack([gamma, beta, run_mean, run_var], axis=0)  # (4, OUT_C)

    out = primary_capsule_forward(x, weights, bias, bn_params)
    out = jax.block_until_ready(out)

    ref = _reference_forward(x, weights, bias, bn_params)
    assert out.shape == (B, NUM_CAPS * (L - K + 1), OUT_C), out.shape
    max_err = float(jnp.max(jnp.abs(out - ref)))
    assert jnp.allclose(out, ref, rtol=2e-5, atol=2e-5), max_err

    print("KERNEL_OK")
</pallas_src>

<mosaic_0001>
module attributes {stable_mosaic.version = 11 : i64} {
  func.func @_primary_capsule_kernel(%arg0: i32, %arg1: memref<16x64xf32, #tpu.memory_space<vmem>>, %arg2: memref<3x64x64xf32, #tpu.memory_space<vmem>>, %arg3: memref<1x64xf32, #tpu.memory_space<vmem>>, %arg4: memref<64x64xf32, #tpu.memory_space<vmem>>, %arg5: memref<16x64xf32, #tpu.memory_space<vmem>>) attributes {dimension_semantics = [#tpu.dimension_semantics<parallel>], iteration_bounds = array<i64: 2>, scalar_prefetch = 0 : i64, scratch_operands = 0 : i64, tpu.core_type = #tpu.core_type<tc>, window_params = [{transform_indices = @transform_0, window_bounds = array<i64: 16, 64>}, {pipeline_mode = #tpu.pipeline_mode<synchronous>, transform_indices = @transform_1, window_bounds = array<i64: 3, 64, 64>}, {pipeline_mode = #tpu.pipeline_mode<synchronous>, transform_indices = @transform_2, window_bounds = array<i64: 1, 64>}, {pipeline_mode = #tpu.pipeline_mode<synchronous>, transform_indices = @transform_3, window_bounds = array<i64: 64, 64>}, {transform_indices = @transform_4, window_bounds = array<i64: 16, 64>}]} {
    %c0 = arith.constant 0 : index
    %c0_0 = arith.constant 0 : index
    %0 = vector.load %arg1[%c0, %c0_0] : memref<16x64xf32, #tpu.memory_space<vmem>>, vector<16x64xf32>
    %c0_1 = arith.constant 0 : index
    %c0_2 = arith.constant 0 : index
    %c0_3 = arith.constant 0 : index
    %1 = vector.load %arg2[%c0_1, %c0_2, %c0_3] : memref<3x64x64xf32, #tpu.memory_space<vmem>>, vector<1x64x64xf32>
    %2 = vector.shape_cast %1 : vector<1x64x64xf32> to vector<64x64xf32>
    %cst = arith.constant dense<0.000000e+00> : vector<16x64xf32>
    %3 = tpu.matmul %0, %2, %cst {dimension_numbers = #tpu.dot_dimension_numbers<[1], [0], [0], [1], [0, 0, 1, 1], [], []>} : vector<16x64xf32>, vector<64x64xf32>, vector<16x64xf32> -> vector<16x64xf32>
    %4 = vector.extract_strided_slice %3 {offsets = [0, 0], sizes = [14, 64], strides = [1, 1]} : vector<16x64xf32> to vector<14x64xf32>
    %c1 = arith.constant 1 : index
    %c0_4 = arith.constant 0 : index
    %c0_5 = arith.constant 0 : index
    %5 = vector.load %arg2[%c1, %c0_4, %c0_5] : memref<3x64x64xf32, #tpu.memory_space<vmem>>, vector<1x64x64xf32>
    %6 = vector.shape_cast %5 : vector<1x64x64xf32> to vector<64x64xf32>
    %cst_6 = arith.constant dense<0.000000e+00> : vector<16x64xf32>
    %7 = tpu.matmul %0, %6, %cst_6 {dimension_numbers = #tpu.dot_dimension_numbers<[1], [0], [0], [1], [0, 0, 1, 1], [], []>} : vector<16x64xf32>, vector<64x64xf32>, vector<16x64xf32> -> vector<16x64xf32>
    %8 = vector.extract_strided_slice %7 {offsets = [1, 0], sizes = [14, 64], strides = [1, 1]} : vector<16x64xf32> to vector<14x64xf32>
    %9 = arith.addf %4, %8 : vector<14x64xf32>
    %c2 = arith.constant 2 : index
    %c0_7 = arith.constant 0 : index
    %c0_8 = arith.constant 0 : index
    %10 = vector.load %arg2[%c2, %c0_7, %c0_8] : memref<3x64x64xf32, #tpu.memory_space<vmem>>, vector<1x64x64xf32>
    %11 = vector.shape_cast %10 : vector<1x64x64xf32> to vector<64x64xf32>
    %cst_9 = arith.constant dense<0.000000e+00> : vector<16x64xf32>
    %12 = tpu.matmul %0, %11, %cst_9 {dimension_numbers = #tpu.dot_dimension_numbers<[1], [0], [0], [1], [0, 0, 1, 1], [], []>} : vector<16x64xf32>, vector<64x64xf32>, vector<16x64xf32> -> vector<16x64xf32>
    %13 = vector.extract_strided_slice %12 {offsets = [2, 0], sizes = [14, 64], strides = [1, 1]} : vector<16x64xf32> to vector<14x64xf32>
    %14 = arith.addf %9, %13 : vector<14x64xf32>
    %c0_10 = arith.constant 0 : index
    %c0_11 = arith.constant 0 : index
    %15 = vector.load %arg3[%c0_10, %c0_11] : memref<1x64xf32, #tpu.memory_space<vmem>>, vector<1x64xf32>
    %16 = vector.broadcast %15 : vector<1x64xf32> to vector<14x64xf32>
    %17 = arith.addf %14, %16 : vector<14x64xf32>
    %18 = arith.mulf %17, %17 : vector<14x64xf32>
    %c0_12 = arith.constant 0 : index
    %c0_13 = arith.constant 0 : index
    %19 = vector.load %arg4[%c0_12, %c0_13] : memref<64x64xf32, #tpu.memory_space<vmem>>, vector<64x64xf32>
    %cst_14 = arith.constant dense<0.000000e+00> : vector<14x64xf32>
    %20 = tpu.matmul %18, %19, %cst_14 {dimension_numbers = #tpu.dot_dimension_numbers<[1], [0], [0], [1], [0, 0, 1, 1], [], []>} : vector<14x64xf32>, vector<64x64xf32>, vector<14x64xf32> -> vector<14x64xf32>
    %21 = arith.mulf %17, %20 : vector<14x64xf32>
    %cst_15 = arith.constant 1.000000e+00 : f32
    %22 = vector.broadcast %cst_15 : f32 to vector<14x64xf32>
    %23 = arith.addf %22, %20 : vector<14x64xf32>
    %24 = math.sqrt %20 : vector<14x64xf32>
    %cst_16 = arith.constant 9.99999993E-9 : f32
    %25 = vector.broadcast %cst_16 : f32 to vector<14x64xf32>
    %26 = arith.addf %24, %25 : vector<14x64xf32>
    %27 = arith.mulf %23, %26 : vector<14x64xf32>
    %28 = arith.divf %21, %27 : vector<14x64xf32>
    %c0_17 = arith.constant 0 : index
    %c0_18 = arith.constant 0 : index
    %29 = vector.load %arg5[%c0_17, %c0_18] : memref<16x64xf32, #tpu.memory_space<vmem>>, vector<14x64xf32>
    tpu.vector_store %arg5[%c0_17, %c0_18], %28 {strides = array<i32>} : memref<16x64xf32, #tpu.memory_space<vmem>>, vector<14x64xf32>,
    return
  }
  func.func @transform_0(%arg0: i32) -> (i32, i32) {
    %c0_i32 = arith.constant 0 : i32
    %c0_i32_0 = arith.constant 0 : i32
    return %arg0, %c0_i32 : i32, i32
  }
  func.func @transform_1(%arg0: i32) -> (i32, i32, i32) {
    %c0_i32 = arith.constant 0 : i32
    %c0_i32_0 = arith.constant 0 : i32
    %c0_i32_1 = arith.constant 0 : i32
    %c0_i32_2 = arith.constant 0 : i32
    return %c0_i32, %c0_i32_0, %c0_i32_1 : i32, i32, i32
  }
  func.func @transform_2(%arg0: i32) -> (i32, i32) {
    %c0_i32 = arith.constant 0 : i32
    %c0_i32_0 = arith.constant 0 : i32
    %c0_i32_1 = arith.constant 0 : i32
    return %c0_i32, %c0_i32_0 : i32, i32
  }
  func.func @transform_3(%arg0: i32) -> (i32, i32) {
    %c0_i32 = arith.constant 0 : i32
    %c0_i32_0 = arith.constant 0 : i32
    %c0_i32_1 = arith.constant 0 : i32
    return %c0_i32, %c0_i32_0 : i32, i32
  }
  func.func @transform_4(%arg0: i32) -> (i32, i32) {
    %c0_i32 = arith.constant 0 : i32
    %c0_i32_0 = arith.constant 0 : i32
    return %arg0, %c0_i32 : i32, i32
  }
}

</mosaic_0001>

<bundles_post_ra>
// kernel: tpu_custom_call.1
= control target key start
LH: loop header
LB: loop body
LE: loop exit
PB: predicated region body
PF: predicated region fallthrough
CT: control target
= control target key end

     0   :  { %9 = vsyncpa [#allocation3], 0  ;;  %s1082_s0 = inlined_call_operand.hbm [shape: f32[32,64], index: 0, kind: input, shape index: {}]   ;;  %s1083_s1 = inlined_call_operand.hbm [shape: f32[3,64,64], index: 1, kind: input, shape index: {}]   ;;  %s1084_s2 = inlined_call_operand.vmem [shape: f32[1,64], index: 2, kind: input, shape index: {}]   ;;  %s1085_s3 = inlined_call_operand.hbm [shape: f32[64,64], index: 3, kind: input, shape index: {}]   ;;  %s1086_s4 = inlined_call_operand.hbm [shape: f32[32,64], index: 4, kind: output, shape index: {}]  }
   0x1   :  { %11 = vsyncpa [#allocation3 + $0x1], 0 }
   0x2   :  { %12 = vsyncpa [#allocation6], 0 }
   0x3   :  { %13 = vsyncpa [#allocation4], 0 }
   0x4   :  { %15 = vsyncpa [#allocation4 + $0x1], 0  ;;  %s896_s15 = smov 0   ;;  %s898_s16 = smov 0  }
   0x5   :  { %s900_s17 = smov 0   ;;  %s902_s18 = smov 0  }
   0x6 LB: > { %s917_s19 = sadd.s32 4294967295, %s863_s18   ;;  %s595_s20 = sadd.s32 4294967294, %s863_s18   ;;  %s863_s18 = sphi %s902_s18, %s1096_s18   ;;  %s859_s17 = sphi %s900_s17, %s1095_s17   ;;  %s855_s16 = sphi %s898_s16, %s1094_s16   ;;  %s851_s15 = sphi %s896_s15, %s1093_s15  }
   0x7   : > { %p41_p0 = scmp.ne.s32.totalorder %s855_s16, %s851_s15  ;;  %p42_p1 = scmp.eq.s32.totalorder %s917_s19, 0 }
   0x8   : > { %p128_p2 = scmp.eq.s32.totalorder %s917_s19, 1  ;;  %p134_p3 = scmp.eq.s32.totalorder %s595_s20, 1 }
   0x9   : > { %p926_p4 = por %p42_p1, %p41_p0  ;;  %p596_p5 = scmp.ge.s32.totalorder %s863_s18, 1 }
   0xa   : > { %p931_p6 = por %p134_p3, %p41_p0  ;;  %p141_p7 = scmp.lt.s32.totalorder %s863_s18, 3 }
   0xb   : > { %s152_s25 = sshll.u32 %s1083_s1, 4  ;;  %s865_s27 = smov [#allocation5]   ;;  %s153_s25 = int_to_ptr.hbm [resolvable:$true] %s152_s25 }
   0xc   : > { %p939_p8 = pnand %p596_p5, %p141_p7  ;;  %s154_s28 = sshll.u32 %s865_s27, 4  ;;  %s155_s28 = int_to_ptr.vmem [resolvable:$true] %s154_s28 }
   0xd   : > { %s169_s5 = sshll.u32 %s1085_s3, 4  ;;  %s866_s6 = smov 128   ;;  %s170_s5 = int_to_ptr.hbm [resolvable:$true] %s169_s5 }
   0xe   : > { %p635_p9 = pneg %p939_p8  ;;  %s867_s7 = smov 8  }
   0xf   : > { %s868_s8 = smov [#allocation7]   ;;  %s958_s10 = sadd.s32 1, %s863_s18  }
  0x10   : > { %p636_p10 = pnand %p635_p9, %p42_p1  ;;  %s171_s9 = sshll.u32 %s868_s8, 4  ;;  %s172_s9 = int_to_ptr.vmem [resolvable:$true] %s171_s9 }
  0x11   : > { %s28_s11 = sadd.s32 1, %s859_s17  ;;  %s25_s12 = ssub.s32 %s863_s18, %s958_s10 }
  0x12   : > { %638 = dma.hbm_to_vmem [thread:$0]  (!%p636_p10), %s153_s25, 3072, %s155_s28, [#allocation6], %s866_s6, %s866_s6, %s867_s7  }
  0x13   : > { %641 = dma.hbm_to_vmem [thread:$0]  (!%p636_p10), %s170_s5, 1024, %s172_s9, [#allocation6], %s866_s6, %s866_s6, %s867_s7  }
  0x14   : > { %p35_p12 = scmp.ne.s32.totalorder %s859_s17, %s855_s16  ;;  %p26_p13 = scmp.eq.s32.totalorder %s25_s12, 0 }
  0x15   : > { %p36_p0 = scmp.eq.s32.totalorder %s863_s18, 0  ;;  %p652_p5 = scmp.lt.s32.totalorder %s863_s18, 2 }
  0x16   : > { %p968_p3 = por %p128_p2, %p35_p12  ;;  %s185_s20 = sand.u32 1, %s859_s17  }
  0x17   : > { %s974_s14 = scalar_select %p26_p13, %s859_s17, %s28_s11  }
  0x18   : > { %p37_p7 = por %p36_p0, %p35_p12  ;;  %s600_s23 = sshll.u32 %s185_s20, 4 }
  0x19   : > { %s621_s24 = sshll.u32 %s863_s18, 4  ;;  %s189_s29 = scalar_lea.vmem [#allocation2], %s600_s23 }
  0x1a   : > { %s194_s28 = scalar_lea.hbm %s1082_s0, %s621_s24  ;;  %s197_s30 = sshll.u32 %s189_s29, 4  ;;  %s198_s30 = int_to_ptr.vmem [resolvable:$true] %s197_s30 }
  0x1b   : > { %s195_s5 = sshll.u32 %s194_s28, 4  ;;  %p981_p2 = pnand %p652_p5, %p37_p7  ;;  %s196_s5 = int_to_ptr.hbm [resolvable:$true] %s195_s5 }
  0x1c   : > { %s186_s9 = scalar_lea.sflag [#allocation3], %s185_s20  ;;  %s763_s11 = sshra.s32 %s196_s5, 4  ;;  %s764_s11 = int_to_ptr.hbm [resolvable:$true] %s763_s11 }
  0x1d   : > { %s765_s12 = scalar_lea.hbm %s764_s11, 16  ;;  %p767_p10 = pneg %p981_p2 }
  0x1e   : > { %p766_p9 = scmp.ne.s32.totalorder %s764_s11, %s765_s12  ;;  %s770_s25 = scalar_lea.hbm %s1082_s0, 32 }
  0x1f   : > { %p771_p0 = scmp.lt.s32.totalorder %s764_s11, %s1082_s0  ;;  %p772_p5 = scmp.lt.s32.totalorder %s770_s25, %s765_s12 }
  0x20   : > { %p768_p12 = pnand %p767_p10, %p766_p9 }
  0x21   : > { %p773_p7 = por %p772_p5, %p771_p0 }
  0x22   : > { %p769_p13 = pneg %p768_p12 }
  0x24   : > { %p774_p11 = pnand %p773_p7, %p769_p13 }
  0x26   : > { %777 = shalt.err (!%p774_p11)
}
  0x27   : > { %645 = dma.hbm_to_vmem [thread:$0]  (!%p981_p2), %s196_s5, 256, %s198_s30, %s186_s9, %s866_s6, %s866_s6, %s867_s7  }
  0x28   : > { %209 = sbr.rel (%p939_p8) target bundleno = 402 (0x192), region = 36  ;;  %s1001_s20 = sand.u32 (!%p939_p8), 1, %s855_s16  }
  0x29   : > { %s604_s29 = sshll.u32 (!%p939_p8), %s1001_s20, 4  ;;  %s212_s11 = scalar_lea.sflag (!%p939_p8), [#allocation3], %s1001_s20 }
  0x2a   : > { %s1007_s12 = scalar_lea.vmem (!%p939_p8), [#allocation2], %s604_s29 }
  0x2d   : > { %838 = dma.done.wait (%p926_p4), %s212_s11, 256  }
  0x2e   : > { %840 = vsyncadd (%p926_p4), %s212_s11, 4294967040 }
  0x2f   : > { %842 = dma.done.wait (%p42_p1), [#allocation6], 4096  }
  0x30   : > { %844 = vsyncadd (%p42_p1), [#allocation6], 4294963200  ;;  %v301_v0 = vld [vmem:[#allocation5 + $0x78] sm:$0xff]  ;;  %v300_v2 = vld [vmem:[#allocation5 + $0x70] sm:$0xff]  ;;  %vm263_vm0 = vcmask 523264   ;;  %vm327_vm1 = vcmask 1046528  }
  0x31   : > { %v343_v1 = vld [vmem:[#allocation5 + $0xb8] sm:$0xff]  ;;  %310 = vmatpush.msra.mxu1 %v301_v0  ;;  %v342_v3 = vld [vmem:[#allocation5 + $0xb0] sm:$0xff]  ;;  %v299_v4 = vld [vmem:[#allocation5 + $0x68] sm:$0xff]  ;;  %vm369_vm2 = vcmask 1045504   ;;  %s622_s6 = sshll.u32 %s917_s19, 4  ;;  %s250_s8 = scalar_lea.vmem [#allocation8], %s604_s29 }
  0x32   : > { %352 = vmatpush.msra.mxu2 %v343_v1  ;;  %v341_v5 = vld [vmem:[#allocation5 + $0xa8] sm:$0xff]  ;;  %v262_v6 = vld [vmem:[#allocation5 + $0x38] sm:$0xff]  ;;  %v261_v7 = vld [vmem:[#allocation5 + $0x30] sm:$0xff]  ;;  %s499_s5 = scalar_lea.hbm %s1086_s4, %s622_s6  ;;  %s500_s9 = sshll.u32 %s250_s8, 4  ;;  %vm485_vm15 = vcmask 521216   ;;  %s501_s9 = int_to_ptr.vmem [resolvable:$true] %s500_s9 }
  0x33   : > { %311 = vmatpush.msra.mxu1 %v300_v2  ;;  %278 = vmatpush.msra.mxu0 %v262_v6  ;;  %v298_v8 = vld [vmem:[#allocation5 + $0x60] sm:$0xff]  ;;  %v260_v10 = vld [vmem:[#allocation5 + $0x28] sm:$0xff]  ;;  %v297_v11 = vld [vmem:[#allocation5 + $0x58] sm:$0xff]  ;;  %s502_s19 = sshll.u32 %s499_s5, 4  ;;  %s488_s24 = scalar_lea.sflag [#allocation4], %s1001_s20  ;;  %s503_s19 = int_to_ptr.hbm [resolvable:$true] %s502_s19 }
  0x34   : > { %353 = vmatpush.msra.mxu2 %v342_v3  ;;  %v340_v9 = vld [vmem:[#allocation5 + $0xa0] sm:$0xff]  ;;  %v339_v12 = vld [vmem:[#allocation5 + $0x98] sm:$0xff]  ;;  %v296_v14 = vld [vmem:[#allocation5 + $0x50] sm:$0xff]  ;;  %s807_s23 = sshra.s32 %s503_s19, 4  ;;  %s813_s29 = scalar_lea.hbm %s1086_s4, 32  ;;  %s808_s23 = int_to_ptr.hbm [resolvable:$true] %s807_s23 }
  0x35   : > { %312 = vmatpush.msra.mxu1 %v299_v4  ;;  %279 = vmatpush.msra.mxu0 %v261_v7  ;;  %v259_v13 = vld [vmem:[#allocation5 + $0x20] sm:$0xff]  ;;  %v338_v15 = vld [vmem:[#allocation5 + $0x90] sm:$0xff]  ;;  %v258_v16 = vld [vmem:[#allocation5 + $0x18] sm:$0xff]  ;;  %s809_s25 = scalar_lea.hbm %s808_s23, 16  ;;  %p814_p11 = scmp.lt.s32.totalorder %s808_s23, %s1086_s4 }
  0x36   : > { %354 = vmatpush.msra.mxu2 %v341_v5  ;;  %v295_v17 = vld [vmem:[#allocation5 + $0x48] sm:$0xff]  ;;  %v257_v19 = vld [vmem:[#allocation5 + $0x10] sm:$0xff]  ;;  %v294_v20 = vld [vmem:[#allocation5 + $0x40] sm:$0xff]  ;;  %p810_p1 = scmp.ne.s32.totalorder %s808_s23, %s809_s25  ;;  %p815_p2 = scmp.lt.s32.totalorder %s813_s29, %s809_s25 }
  0x37   : > { %313 = vmatpush.msra.mxu1 %v298_v8  ;;  %280 = vmatpush.msra.mxu0 %v260_v10  ;;  %v337_v18 = vld [vmem:[#allocation5 + $0x88] sm:$0xff]  ;;  %v336_v21 = vld [vmem:[#allocation5 + $0x80] sm:$0xff]  ;;  %v392_v26 = vld [vmem:[#allocation7 + $0x38] sm:$0xff] }
  0x38   : > { %355 = vmatpush.msra.mxu2 %v340_v9  ;;  %v253_v22 = vld [vmem:[%s1007_s12] sm:$0xff]  ;;  %v256_v23 = vld [vmem:[#allocation5 + $0x8] sm:$0xff]  ;;  %407 = vmatpush.msra.mxu3 %v392_v26  ;;  %v388_v30 = vld [vmem:[#allocation7 + $0x18] sm:$0xff]  ;;  %p811_p4 = pnand %p810_p1, %p968_p3  ;;  %p816_p9 = por %p815_p2, %p814_p11 }
  0x39   : > { %314 = vmatpush.msra.mxu1 %v297_v11  ;;  %281 = vmatpush.msra.mxu0 %v259_v13  ;;  %v255_v24 = vld [vmem:[#allocation5] sm:$0xff]  ;;  %v254_v25 = vld [vmem:[%s1007_s12 + $0x8] sm:$0xff]  ;;  %v391_v27 = vld [vmem:[#allocation7 + $0x30] sm:$0xff] }
  0x3a   : > { %356 = vmatpush.msra.mxu2 %v339_v12  ;;  %408 = vmatpush.msra.mxu3 %v391_v27  ;;  %v390_v28 = vld [vmem:[#allocation7 + $0x28] sm:$0xff]  ;;  %v389_v29 = vld [vmem:[#allocation7 + $0x20] sm:$0xff]  ;;  %v387_v31 = vld [vmem:[#allocation7 + $0x10] sm:$0xff]  ;;  %p812_p8 = pneg %p811_p4 }
  0x3b   : > { %315 = vmatpush.msra.mxu1 %v296_v14  ;;  %282 = vmatpush.msra.mxu0 %v258_v16  ;;  %v386_v32 = vld [vmem:[#allocation7 + $0x8] sm:$0xff]  ;;  %v385_v33 = vld [vmem:[#allocation7] sm:$0xff] }
  0x3c   : > { %357 = vmatpush.msra.mxu2 %v338_v15  ;;  %409 = vmatpush.msra.mxu3 %v390_v28  ;;  %v694_v46 = vld [vmem:[%s1084_s2] ss:$0 sm:$0xff]  ;;  %p817_p10 = pnand %p816_p9, %p812_p8 }
  0x3d   : > { %316 = vmatpush.msra.mxu1 %v295_v17  ;;  %283 = vmatpush.msra.mxu0 %v257_v19 }
  0x3e   : > { %358 = vmatpush.msra.mxu2 %v337_v18  ;;  %410 = vmatpush.msra.mxu3 %v389_v29 }
  0x3f   : > { %317 = vmatpush.msra.mxu1 %v294_v20  ;;  %284 = vmatpush.msra.mxu0 %v256_v23 }
  0x40   : > { %359 = vmatpush.msra.mxu2 %v336_v21  ;;  %610 = vmatmul.msk.f32.vlgmr.msra.gmra.mxu1 %vm263_vm0, %v253_v22 }
  0x41   : > { %612 = vmatmul.msk.f32.vlgmr.msra.gmra.mxu2 %vm263_vm0, %v253_v22  ;;  %285 = vmatpush.msra.mxu0 %v255_v24 }
  0x42   : > { %608 = vmatmul.msk.f32.vlgmr.msra.gmra.mxu0 %vm263_vm0, %v253_v22  ;;  %411 = vmatpush.msra.mxu3 %v388_v30 }
  0x44   : > { %412 = vmatpush.msra.mxu3 %v387_v31 }
  0x46   : > { %413 = vmatpush.msra.mxu3 %v386_v32 }
  0x48   : > { %611 = vmatmul.msk.f32.gmra.mxu1 %vm263_vm0, %v254_v25  ;;  %414 = vmatpush.msra.mxu3 %v385_v33 }
  0x49   : > { %613 = vmatmul.msk.f32.gmra.mxu2 %vm263_vm0, %v254_v25 }
  0x4a   : > { %609 = vmatmul.msk.f32.gmra.mxu0 %vm263_vm0, %v254_v25 }
  0xbd   : > { %v319_v34 = vpop.f32.mrf.mxu1 }
  0xbe   : > { %v328_v39 = vrot.slane %v319_v34, 1 }
  0xbf   : > { %v287_v35 = vpop.f32.mrf.mxu0 }
  0xc4   : > { %v361_v36 = vpop.f32.mrf.mxu2 }
  0xc5   : > { %v322_v37 = vpop.f32.mrf.mxu1  ;;  %v370_v42 = vrot.slane %v361_v36, 2 }
  0xc6   : > { %v329_v38 = vrot.slane %v322_v37, 1 }
  0xc7   : > { %v290_v43 = vpop.f32.mrf.mxu0 }
  0xc8   : > { %v330_v40 = vsel %vm327_vm1, %v328_v39, %v329_v38  ;;  %v334_v48 = vadd.f32 %v329_v38, %v290_v43 }
  0xc9   : > { %v333_v45 = vadd.f32 %v330_v40, %v287_v35 }
  0xcc   : > { %v364_v41 = vpop.f32.mrf.mxu2 }
  0xcd   : > { %v371_v44 = vrot.slane %v364_v41, 2 }
  0xcf   : > { %v372_v47 = vsel %vm369_vm2, %v370_v42, %v371_v44  ;;  %v376_v51 = vadd.f32 %v371_v44, %v334_v48 }
  0xd0   : > { %v375_v49 = vadd.f32 %v372_v47, %v333_v45 }
  0xd1   : > { %v1029_v53 = vadd.f32 %v694_v46, %v376_v51 }
  0xd2   : > { %v381_v50 = vadd.f32 %v694_v46, %v375_v49 }
  0xd3   : > { %v384_v54 = vmul.f32 %v1029_v53, %v1029_v53 }
  0xd4   : > { %v383_v52 = vmul.f32 %v381_v50, %v381_v50 }
  0xd6   : > { %614 = vmatmul.msk.f32.vlgmr.msra.gmra.mxu3 %vm263_vm0, %v383_v52 }
  0xde   : > { %615 = vmatmul.msk.f32.gmra.mxu3 %vm263_vm0, %v384_v54 }
 0x159   : > { %v416_v55 = vpop.f32.mrf.mxu3 }
 0x15a   : > { %695 = vrsqrt.f32 %v416_v55  ;;  %vm433_vm3 = vcmp.eq.f32.partialorder %v416_v55, inf  ;;  %v436_v3 = vand.u32 2147483648, %v416_v55  ;;  %vm435_vm4 = vcmp.eq.f32.partialorder %v416_v55, 0.0 }
 0x15b   : > { %v424_v7 = vadd.f32 1.0, %v416_v55  ;;  %v422_v28 = vmul.f32 %v416_v55, %v381_v50 }
 0x160   : > { %v696_v56 = vpop.eup %695 }
 0x161   : > { %v427_v57 = vmul.f32 %v696_v56, %v416_v55  ;;  %v1034_v58 = vpop.f32.mrf.mxu3 }
 0x162   : > { %697 = vrsqrt.f32 %v1034_v58  ;;  %vm445_vm5 = vcmp.eq.f32.partialorder %v1034_v58, inf  ;;  %v448_v13 = vand.u32 2147483648, %v1034_v58  ;;  %vm447_vm6 = vcmp.eq.f32.partialorder %v1034_v58, 0.0 }
 0x163   : > { %v428_v59 = vmul.f32 %v696_v56, %v427_v57  ;;  %v425_v16 = vadd.f32 1.0, %v1034_v58  ;;  %v423_v39 = vmul.f32 %v1034_v58, %v1029_v53 }
 0x165   : > { %v429_v60 = vmul.f32 0.5, %v428_v59 }
 0x167   : > { %v430_v61 = vsub.f32 1.5, %v429_v60 }
 0x168   : > { %v698_v62 = vpop.eup %697 }
 0x169   : > { %v431_v63 = vmul.f32 %v696_v56, %v430_v61  ;;  %v439_v0 = vmul.f32 %v698_v62, %v1034_v58 }
 0x16b   : > { %v432_v1 = vmul.f32 %v431_v63, %v416_v55  ;;  %v440_v2 = vmul.f32 %v698_v62, %v439_v0 }
 0x16d   : > { %v434_v4 = vsel %vm433_vm3, %v416_v55, %v432_v1  ;;  %v441_v5 = vmul.f32 0.5, %v440_v2 }
 0x16e   : > { %v437_v6 = vsel %vm435_vm4, %v436_v3, %v434_v4 }
 0x16f   : > { %v450_v8 = vadd.f32 1e-08, %v437_v6  ;;  %v442_v9 = vsub.f32 1.5, %v441_v5 }
 0x171   : > { %v452_v10 = vmul.f32 %v450_v8, %v424_v7  ;;  %v443_v11 = vmul.f32 %v698_v62, %v442_v9 }
 0x173   : > { %699 = vrcp.f32 %v452_v10  ;;  %v444_v12 = vmul.f32 %v443_v11, %v1034_v58  ;;  %v465_v22 = vand.u32 2147483648, %v452_v10  ;;  %v463_v24 = vand.u32 2147483647, %v452_v10 }
 0x174   : > { %vm459_vm8 = vweird.f32 %v452_v10 }
 0x175   : > { %v446_v14 = vsel %vm445_vm5, %v1034_v58, %v444_v12  ;;  %v466_v27 = vor.u32 1.1754944e-38, %v465_v22  ;;  %vm464_vm10 = vcmp.eq.f32.partialorder %v463_v24, 8.507059e+37 }
 0x176   : > { %v449_v15 = vsel %vm447_vm6, %v448_v13, %v446_v14 }
 0x177   : > { %v451_v17 = vadd.f32 1e-08, %v449_v15 }
 0x179   : > { %v700_v18 = vpop.eup %699  ;;  %v453_v19 = vmul.f32 %v451_v17, %v425_v16 }
 0x17a   : > { %v455_v20 = vmul.f32 %v700_v18, %v452_v10  ;;  %vm460_vm7 = vweird.f32 %v700_v18 }
 0x17b   : > { %701 = vrcp.f32 %v453_v19  ;;  %vm461_vm9 = vmor %vm459_vm8, %vm460_vm7  ;;  %v480_v34 = vand.u32 2147483648, %v453_v19  ;;  %v478_v36 = vand.u32 2147483647, %v453_v19  ;;  %vm474_vm12 = vweird.f32 %v453_v19 }
 0x17c   : > { %v456_v21 = vsub.f32 1.0, %v455_v20 }
 0x17d   : > { %v481_v38 = vor.u32 1.1754944e-38, %v480_v34  ;;  %vm479_vm14 = vcmp.eq.f32.partialorder %v478_v36, 8.507059e+37 }
 0x17e   : > { %v457_v23 = vmul.f32 %v700_v18, %v456_v21 }
 0x180   : > { %v458_v25 = vadd.f32 %v700_v18, %v457_v23 }
 0x181   : > { %v702_v26 = vpop.eup %701 }
 0x182   : > { %v470_v29 = vmul.f32 %v702_v26, %v453_v19  ;;  %v462_v30 = vsel %vm461_vm9, %v700_v18, %v458_v25  ;;  %vm475_vm11 = vweird.f32 %v702_v26 }
 0x183   : > { %v467_v31 = vsel %vm464_vm10, %v466_v27, %v462_v30  ;;  %vm476_vm13 = vmor %vm474_vm12, %vm475_vm11 }
 0x184   : > { %v471_v32 = vsub.f32 1.0, %v470_v29  ;;  %v468_v33 = vmul.f32 %v467_v31, %v422_v28 }
 0x186   : > { %v472_v35 = vmul.f32 %v702_v26, %v471_v32  ;;  %484 = vst.msk [vmem:[%s250_s8] sm:$0xff] %vm263_vm0, %v468_v33 }
 0x188   : > { %v473_v37 = vadd.f32 %v702_v26, %v472_v35 }
 0x18a   : > { %v477_v40 = vsel %vm476_vm13, %v702_v26, %v473_v37 }
 0x18b   : > { %v482_v41 = vsel %vm479_vm14, %v481_v38, %v477_v40 }
 0x18c   : > { %v483_v42 = vmul.f32 %v482_v41, %v423_v39 }
 0x18e   : > { %486 = vst.msk [vmem:[%s250_s8 + $0x8] sm:$0x3f] %vm485_vm15, %v483_v42 }
 0x18f   : > { %820 = shalt.err (!%p817_p10)
}
 0x190   : > { %s869_s20 = smov 128   ;;  %s870_s21 = smov 8  }
 0x191   : > { %633 = dma.vmem_to_hbm [thread:$0]  (%p968_p3), %s501_s9, 256, %s503_s19, %s488_s24, %s869_s20, %s869_s20, %s870_s21  }
 0x192 PF: > { %s517_s26 = sand.u32 1, %s851_s15   ;;  %p1092_p12 = scmp.ge.s32.totalorder %s863_s18, 2 }
 0x193   : > { %s518_s6 = scalar_lea.sflag [#allocation4], %s517_s26 }
 0x194   : > { %p647_p13 = pnand %p1092_p12, %p931_p6 }
 0x196   : > { %p648_p0 = pneg %p647_p13 }
 0x198   : > { %846 = dma.done.wait (%p648_p0), %s518_s6, 256  }
 0x199   : > { %848 = vsyncadd (%p648_p0), %s518_s6, 4294967040  ;;  %p18_p5 = scmp.ge.s32.totalorder %s958_s10, 4   ;;  %s1093_s15 = smov %s855_s16 }
 0x19a   : > { %s1094_s16 = smov %s859_s17  ;;  %s1095_s17 = smov %s974_s14 }
 0x19b   : > { %s1096_s18 = smov %s958_s10  ;;  %20 = sbr.rel (!%p18_p5) target bundleno = 6 (0x6), region = 91 }
 0x1a0   :  { %524 = vsyncpa [#allocation3], 1 }
 0x1a1   :  { %526 = vsyncpa [#allocation3 + $0x1], 1 }
 0x1a2   :  { %527 = vsyncpa [#allocation6], 1 }
 0x1a3   :  { %528 = vsyncpa [#allocation4], 1 }
 0x1a4   :  { %530 = vsyncpa [#allocation4 + $0x1], 1 }

</bundles_post_ra>
